<compile_context>
chip_gen: v5e
topology: v5e:2x2
jax: 0.10.0
libtpu: 0.0.40
codegen_flags: <defaults>
</compile_context>

<pallas_src>
import functools

import jax
import jax.numpy as jnp
import numpy as np
from jax.experimental import pallas as pl
from jax.experimental.pallas import tpu as pltpu

NEG_DEFAULT = -1000000.0  # is_minimizer() == False (maximizer) default


def _round_up(x, m):
    return (x + m - 1) // m * m


def _rank_kernel(h_ref, r_ref, et_ref, fmask_ref, tails_ref, tgt_ref,
                 rank_ref, *score_ref):
    """One (batch-tile i, entity-tile j) step of the filtered ranking."""
    j = pl.program_id(1)

    @pl.when(j == 0)
    def _():
        rank_ref[...] = jnp.zeros_like(rank_ref)

    q = h_ref[...] * r_ref[...]                                   # VPU gate
    s = jnp.dot(q, et_ref[...],
                preferred_element_type=jnp.float32)               # MXU [tb,te]

    tb, te = s.shape
    col = jax.lax.broadcasted_iota(jnp.int32, (tb, te), 1) + j * te
    is_tail = col == tails_ref[...]                               # [tb, te]
    filtered = fmask_ref[...].astype(jnp.int32) > 0               # int8 mask
    tgt = tgt_ref[...]                                            # [tb, 1]

    # all_scores[i, filter_out] = default ; all_scores[i, tail] = target
    filt = jnp.where(is_tail, tgt, jnp.where(filtered, NEG_DEFAULT, s))

    # maximizer rank: count of scores >= target, accumulated over E tiles.
    rank_ref[...] += jnp.sum((filt >= tgt).astype(jnp.float32),
                             axis=-1, keepdims=True)

    if score_ref:  # optional debug output: the filtered score matrix tile
        score_ref[0][...] = filt


@functools.partial(jax.jit,
                   static_argnames=("block_b", "block_e", "with_scores"))
def _predict_tails_fused(heads, rels, tails, ent_emb, ent_emb_t, rel_emb,
                         filter_mask, *, block_b, block_e, with_scores):
    B = heads.shape[0]
    E, D = ent_emb.shape

    h = ent_emb[heads].astype(jnp.float32)                        # [B, D]
    r = rel_emb[rels].astype(jnp.float32)                         # [B, D]
    # targets[i] = <E[h_i] * R[r_i], E[t_i]>  — cheap BxD reduce in the glue,
    # fed to the kernel so the rank accumulates in one pass over entities.
    targets = jnp.sum(h * r * ent_emb[tails].astype(jnp.float32),
                      axis=-1, keepdims=True)                     # [B, 1]

    B_pad = _round_up(B, block_b)
    E_pad = _round_up(E, block_e)
    pb, pe = B_pad - B, E_pad - E

    h_p = jnp.pad(h, ((0, pb), (0, 0)))
    r_p = jnp.pad(r, ((0, pb), (0, 0)))
    et_p = jnp.pad(ent_emb_t.astype(jnp.float32), ((0, 0), (0, pe)))
    # Padded entity columns are marked "filtered" so they never contribute.
    fmask_p = jnp.pad(filter_mask.astype(jnp.int8), ((0, pb), (0, pe)),
                      constant_values=1)
    tails_p = jnp.pad(tails.astype(jnp.int32)[:, None], ((0, pb), (0, 0)))
    tgt_p = jnp.pad(targets, ((0, pb), (0, 0)))

    grid = (B_pad // block_b, E_pad // block_e)

    out_shape = [jax.ShapeDtypeStruct((B_pad, 1), jnp.float32)]
    out_specs = [pl.BlockSpec((block_b, 1), lambda i, j: (i, 0))]
    if with_scores:
        out_shape.append(jax.ShapeDtypeStruct((B_pad, E_pad), jnp.float32))
        out_specs.append(
            pl.BlockSpec((block_b, block_e), lambda i, j: (i, j)))

    outs = pl.pallas_call(
        _rank_kernel,
        out_shape=tuple(out_shape),
        grid_spec=pltpu.PrefetchScalarGridSpec(
            num_scalar_prefetch=0,
            grid=grid,
            in_specs=[
                pl.BlockSpec((block_b, D), lambda i, j: (i, 0)),        # E[h]
                pl.BlockSpec((block_b, D), lambda i, j: (i, 0)),        # R[r]
                pl.BlockSpec((D, block_e), lambda i, j: (0, j)),        # E^T
                pl.BlockSpec((block_b, block_e), lambda i, j: (i, j)),  # mask
                pl.BlockSpec((block_b, 1), lambda i, j: (i, 0)),        # tail
                pl.BlockSpec((block_b, 1), lambda i, j: (i, 0)),        # tgt
            ],
            out_specs=tuple(out_specs),
        ),
        compiler_params=pltpu.CompilerParams(
            dimension_semantics=("parallel", "arbitrary"),
            vmem_limit_bytes=48 * 1024 * 1024),
    )(h_p, r_p, et_p, fmask_p, tails_p, tgt_p)

    ranks = outs[0][:B, 0]
    if with_scores:
        return targets[:, 0], ranks, outs[1][:B, :E]
    return targets[:, 0], ranks


def predict_tails(heads, rels, tails, ent_emb, ent_emb_t, rel_emb,
                  filter_mask, with_scores=False):
    """Fused filtered ranking for a batch of (h, r, t) triples."""
    B = int(heads.shape[0])
    E = int(ent_emb.shape[0])
    block_b = min(128, _round_up(B, 32))    # sublane-dense, int8-tile aligned
    block_e = min(512, _round_up(E, 128))   # lane-dense entity tile
    return _predict_tails_fused(heads, rels, tails, ent_emb, ent_emb_t,
                                rel_emb, filter_mask, block_b=block_b,
                                block_e=block_e, with_scores=with_scores)


def invert_triples(triples, num_relations):
    # (h, r, t) -> (t, r + num_relations, h)
    return jnp.stack(
        [triples[:, 2], triples[:, 1] + num_relations, triples[:, 0]], axis=1)


def _merge_direct_inverse(triples, filter_direct, filter_inverse,
                          num_relations):
    inv = invert_triples(triples, num_relations)
    merged = jnp.concatenate([triples, inv], axis=0)
    fmask = jnp.concatenate([filter_direct, filter_inverse], axis=0)
    return merged, fmask


def predict_triples(triples, ent_emb, ent_emb_t, rel_emb, filter_direct,
                    filter_inverse, num_relations):
    """Mirrors Model.predict_triples: direct + inverse in ONE kernel call."""
    assert np.all(np.asarray(triples[:, 1]) < num_relations)
    B = int(triples.shape[0])
    merged, fmask = _merge_direct_inverse(triples, filter_direct,
                                          filter_inverse, num_relations)
    targets, ranks = predict_tails(merged[:, 0], merged[:, 1], merged[:, 2],
                                   ent_emb, ent_emb_t, rel_emb, fmask)
    # Single bulk host transfer; no per-element .item() round trips.
    targets_np, ranks_np = jax.device_get((targets, ranks))
    results = []
    for i in range(B):
        results.append({
            "score": {"tail": float(targets_np[i]),
                      "head": float(targets_np[B + i])},
            "rank": {"tail": int(ranks_np[i]),
                     "head": int(ranks_np[B + i])},
        })
    return results


if __name__ == "__main__":
    key = jax.random.PRNGKey(0)
    num_entities = 256
    num_relations = 5
    dim = 32
    batch = 16

    k_e, k_r, k_h, k_rel, k_t, k_fd, k_fi = jax.random.split(key, 7)

    ent_emb = jax.random.normal(k_e, (num_entities, dim), dtype=jnp.float32)
    rel_emb = jax.random.normal(k_r, (2 * num_relations, dim),
                                dtype=jnp.float32)
    # Hoisted once at "model init"; reused by every predict_triples call.
    ent_emb_t = jnp.asarray(ent_emb.T)

    heads = jax.random.randint(k_h, (batch,), 0, num_entities)
    rels = jax.random.randint(k_rel, (batch,), 0, num_relations)
    tails = jax.random.randint(k_t, (batch,), 0, num_entities)
    triples = jnp.stack([heads, rels, tails], axis=1).astype(jnp.int32)

    # Synthetic dataset.to_filter[(head, rel)] sets, materialized as dense
    # per-row int8 masks (direct and inverse directions).
    filter_direct = jax.random.bernoulli(
        k_fd, 0.05, (batch, num_entities)).astype(jnp.int8)
    filter_inverse = jax.random.bernoulli(
        k_fi, 0.05, (batch, num_entities)).astype(jnp.int8)

    # --- module-facing entry point (fast path: no score-matrix writeback) ---
    results = predict_triples(triples, ent_emb, ent_emb_t, rel_emb,
                              filter_direct, filter_inverse, num_relations)

    # --- verification via the debug variant that also emits filtered scores -
    merged, fmask = _merge_direct_inverse(triples, filter_direct,
                                          filter_inverse, num_relations)
    t_all, rk_all, sc_all = predict_tails(
        merged[:, 0], merged[:, 1], merged[:, 2], ent_emb, ent_emb_t, rel_emb,
        fmask, with_scores=True)
    jax.block_until_ready((t_all, rk_all, sc_all))
    t_np, rk_np, sc_np = jax.device_get((t_all, rk_all, sc_all))

    # float64 numpy reference of the spec semantics.
    ent64 = np.asarray(ent_emb, dtype=np.float64)
    rel64 = np.asarray(rel_emb, dtype=np.float64)
    m_np = np.asarray(merged)
    fm_np = np.asarray(fmask)
    n_rows = 2 * batch
    q64 = ent64[m_np[:, 0]] * rel64[m_np[:, 1]]
    s64 = q64 @ ent64.T
    t64 = s64[np.arange(n_rows), m_np[:, 2]]
    f64v = np.where(fm_np > 0, NEG_DEFAULT, s64)
    f64v[np.arange(n_rows), m_np[:, 2]] = t64

    # 1) filtered score matrix matches reference (loose tol: MXU precision)
    assert np.allclose(sc_np, f64v, atol=0.25, rtol=2e-2), "scores mismatch"
    # 2) target scores match reference
    assert np.allclose(t_np, t64, atol=1e-3, rtol=1e-4), "targets mismatch"
    # 3) in-kernel rank accumulation is exactly consistent with the kernel's
    #    own filtered scores (precision-independent check)
    rank_from_scores = np.sum(sc_np >= t_np[:, None], axis=1)
    assert np.array_equal(rk_np.astype(np.int64),
                          rank_from_scores.astype(np.int64)), "rank mismatch"
    # 4) module-facing results agree with the debug pass
    for i in range(batch):
        assert results[i]["rank"]["tail"] == int(rk_np[i])
        assert results[i]["rank"]["head"] == int(rk_np[batch + i])
        assert abs(results[i]["score"]["tail"] - float(t_np[i])) < 1e-5
        assert abs(results[i]["score"]["head"] - float(t_np[batch + i])) < 1e-5

    print("KERNEL_OK")
</pallas_src>

<mosaic_0001>
module attributes {stable_mosaic.version = 11 : i64} {
  func.func @_rank_kernel(%arg0: i32, %arg1: i32, %arg2: memref<32x32xf32, #tpu.memory_space<vmem>>, %arg3: memref<32x32xf32, #tpu.memory_space<vmem>>, %arg4: memref<32x256xf32, #tpu.memory_space<vmem>>, %arg5: memref<32x256xi8, #tpu.memory_space<vmem>>, %arg6: memref<32x1xi32, #tpu.memory_space<vmem>>, %arg7: memref<32x1xf32, #tpu.memory_space<vmem>>, %arg8: memref<32x1xf32, #tpu.memory_space<vmem>>) attributes {dimension_semantics = [#tpu.dimension_semantics<parallel>, #tpu.dimension_semantics<arbitrary>], iteration_bounds = array<i64: 1, 1>, scalar_prefetch = 0 : i64, scratch_operands = 0 : i64, tpu.core_type = #tpu.core_type<tc>, window_params = [{transform_indices = @transform_0, window_bounds = array<i64: 32, 32>}, {transform_indices = @transform_1, window_bounds = array<i64: 32, 32>}, {transform_indices = @transform_2, window_bounds = array<i64: 32, 256>}, {transform_indices = @transform_3, window_bounds = array<i64: 32, 256>}, {transform_indices = @transform_4, window_bounds = array<i64: 32, 1>}, {transform_indices = @transform_5, window_bounds = array<i64: 32, 1>}, {transform_indices = @transform_6, window_bounds = array<i64: 32, 1>}]} {
    %c0_i32 = arith.constant 0 : i32
    %0 = arith.cmpi eq, %arg1, %c0_i32 : i32
    %1 = arith.extui %0 : i1 to i32
    %c0_i32_0 = arith.constant 0 : i32
    %2 = arith.cmpi ne, %1, %c0_i32_0 : i32
    scf.if %2 {
      %cst_19 = arith.constant 0.000000e+00 : f32
      %34 = vector.broadcast %cst_19 : f32 to vector<32x1xf32>
      %c0_20 = arith.constant 0 : index
      %c0_21 = arith.constant 0 : index
      %35 = vector.load %arg8[%c0_20, %c0_21] : memref<32x1xf32, #tpu.memory_space<vmem>>, vector<32x1xf32>
      tpu.vector_store %arg8[%c0_20, %c0_21], %34 {strides = array<i32>} : memref<32x1xf32, #tpu.memory_space<vmem>>, vector<32x1xf32>,
    } else {
    }
    %c0 = arith.constant 0 : index
    %c0_1 = arith.constant 0 : index
    %3 = vector.load %arg2[%c0, %c0_1] : memref<32x32xf32, #tpu.memory_space<vmem>>, vector<32x32xf32>
    %c0_2 = arith.constant 0 : index
    %c0_3 = arith.constant 0 : index
    %4 = vector.load %arg3[%c0_2, %c0_3] : memref<32x32xf32, #tpu.memory_space<vmem>>, vector<32x32xf32>
    %5 = arith.mulf %3, %4 : vector<32x32xf32>
    %c0_4 = arith.constant 0 : index
    %c0_5 = arith.constant 0 : index
    %6 = vector.load %arg4[%c0_4, %c0_5] : memref<32x256xf32, #tpu.memory_space<vmem>>, vector<32x256xf32>
    %cst = arith.constant dense<0.000000e+00> : vector<32x256xf32>
    %7 = tpu.matmul %5, %6, %cst {dimension_numbers = #tpu.dot_dimension_numbers<[1], [0], [0], [1], [0, 0, 1, 1], [], []>} : vector<32x32xf32>, vector<32x256xf32>, vector<32x256xf32> -> vector<32x256xf32>
    %8 = tpu.iota {dimensions = array<i32: 1>} : vector<32x256xi32>
    %c256_i32 = arith.constant 256 : i32
    %9 = arith.muli %arg1, %c256_i32 : i32
    %10 = vector.broadcast %9 : i32 to vector<32x256xi32>
    %11 = arith.addi %8, %10 : vector<32x256xi32>
    %c0_6 = arith.constant 0 : index
    %c0_7 = arith.constant 0 : index
    %12 = vector.load %arg6[%c0_6, %c0_7] : memref<32x1xi32, #tpu.memory_space<vmem>>, vector<32x1xi32>
    %13 = vector.broadcast %12 : vector<32x1xi32> to vector<32x256xi32>
    %14 = arith.cmpi eq, %11, %13 : vector<32x256xi32>
    %c0_8 = arith.constant 0 : index
    %c0_9 = arith.constant 0 : index
    %15 = vector.load %arg5[%c0_8, %c0_9] : memref<32x256xi8, #tpu.memory_space<vmem>>, vector<32x256xi8>
    %16 = arith.extsi %15 : vector<32x256xi8> to vector<32x256xi32>
    %c0_i32_10 = arith.constant 0 : i32
    %17 = vector.broadcast %c0_i32_10 : i32 to vector<32x256xi32>
    %18 = arith.cmpi sgt, %16, %17 : vector<32x256xi32>
    %c0_11 = arith.constant 0 : index
    %c0_12 = arith.constant 0 : index
    %19 = vector.load %arg7[%c0_11, %c0_12] : memref<32x1xf32, #tpu.memory_space<vmem>>, vector<32x1xf32>
    %cst_13 = arith.constant -1.000000e+06 : f32
    %20 = vector.broadcast %cst_13 : f32 to vector<32x256xf32>
    %21 = arith.select %18, %20, %7 : vector<32x256xi1>, vector<32x256xf32>
    %22 = vector.shape_cast %19 : vector<32x1xf32> to vector<32x1xf32>
    %23 = vector.broadcast %22 : vector<32x1xf32> to vector<32x256xf32>
    %24 = arith.select %14, %23, %21 : vector<32x256xi1>, vector<32x256xf32>
    %c0_14 = arith.constant 0 : index
    %c0_15 = arith.constant 0 : index
    %25 = vector.load %arg8[%c0_14, %c0_15] : memref<32x1xf32, #tpu.memory_space<vmem>>, vector<32x1xf32>
    %26 = vector.broadcast %19 : vector<32x1xf32> to vector<32x256xf32>
    %27 = arith.cmpf oge, %24, %26 : vector<32x256xf32>
    %28 = arith.extui %27 : vector<32x256xi1> to vector<32x256xi32>
    %29 = arith.sitofp %28 : vector<32x256xi32> to vector<32x256xf32>
    %cst_16 = arith.constant dense<0.000000e+00> : vector<32xf32>
    %30 = vector.multi_reduction <add>, %29, %cst_16 [1] : vector<32x256xf32> to vector<32xf32>
    %31 = vector.shape_cast %30 : vector<32xf32> to vector<32x1xf32>
    %32 = arith.addf %25, %31 : vector<32x1xf32>
    %c0_17 = arith.constant 0 : index
    %c0_18 = arith.constant 0 : index
    %33 = vector.load %arg8[%c0_17, %c0_18] : memref<32x1xf32, #tpu.memory_space<vmem>>, vector<32x1xf32>
    tpu.vector_store %arg8[%c0_17, %c0_18], %32 {strides = array<i32>} : memref<32x1xf32, #tpu.memory_space<vmem>>, vector<32x1xf32>,
    return
  }
  func.func @transform_0(%arg0: i32, %arg1: i32) -> (i32, i32) {
    %c0_i32 = arith.constant 0 : i32
    %c0_i32_0 = arith.constant 0 : i32
    return %arg0, %c0_i32 : i32, i32
  }
  func.func @transform_1(%arg0: i32, %arg1: i32) -> (i32, i32) {
    %c0_i32 = arith.constant 0 : i32
    %c0_i32_0 = arith.constant 0 : i32
    return %arg0, %c0_i32 : i32, i32
  }
  func.func @transform_2(%arg0: i32, %arg1: i32) -> (i32, i32) {
    %c0_i32 = arith.constant 0 : i32
    %c0_i32_0 = arith.constant 0 : i32
    return %c0_i32, %arg1 : i32, i32
  }
  func.func @transform_3(%arg0: i32, %arg1: i32) -> (i32, i32) {
    %c0_i32 = arith.constant 0 : i32
    return %arg0, %arg1 : i32, i32
  }
  func.func @transform_4(%arg0: i32, %arg1: i32) -> (i32, i32) {
    %c0_i32 = arith.constant 0 : i32
    %c0_i32_0 = arith.constant 0 : i32
    return %arg0, %c0_i32 : i32, i32
  }
  func.func @transform_5(%arg0: i32, %arg1: i32) -> (i32, i32) {
    %c0_i32 = arith.constant 0 : i32
    %c0_i32_0 = arith.constant 0 : i32
    return %arg0, %c0_i32 : i32, i32
  }
  func.func @transform_6(%arg0: i32, %arg1: i32) -> (i32, i32) {
    %c0_i32 = arith.constant 0 : i32
    %c0_i32_0 = arith.constant 0 : i32
    return %arg0, %c0_i32 : i32, i32
  }
}

</mosaic_0001>

<bundles_post_ra>
// kernel: _predict_tails_fused.1
= control target key start
LH: loop header
LB: loop body
LE: loop exit
PB: predicated region body
PF: predicated region fallthrough
CT: control target
= control target key end

     0   :  { %v294_v0 = vmov 0   ;;  %vm52_vm0 = vcmask 261120   ;;  %v123_v30 = vlaneseq  ;;  %vm27_vm1 = vcmask 7168   ;;  %s522_s2 = inlined_call_operand.vmem [shape: f32[32,256], index: 2, kind: input, shape index: {}]   ;;  %s523_s4 = inlined_call_operand.vmem [shape: s32[32,1], index: 4, kind: input, shape index: {}]   ;;  %s524_s0 = inlined_call_operand.vmem [shape: f32[32,32], index: 0, kind: input, shape index: {}]   ;;  %s525_s1 = inlined_call_operand.vmem [shape: f32[32,32], index: 1, kind: input, shape index: {}]   ;;  %s526_s5 = inlined_call_operand.vmem [shape: f32[32,1], index: 5, kind: input, shape index: {}]   ;;  %s527_s3 = inlined_call_operand.vmem [shape: s8[32,256], index: 3, kind: input, shape index: {}]   ;;  %s528_s6 = inlined_call_operand.vmem [shape: f32[32,1], index: 6, kind: output, shape index: {}]  }
   0x1   :  { %292 = vset.pattern.permute.xlu1 %v294_v0  ;;  %291 = vset.pattern.permute.xlu0 %v294_v0  ;;  %v50_v1 = vld [vmem:[%s522_s2 + $0x30] sm:$0xff]  ;;  %v51_v2 = vld [vmem:[%s522_s2 + $0x38] sm:$0xff]  ;;  %v130_v4 = vld [vmem:[%s523_s4] sm:$0xff]  ;;  %v295_v32 = vmov 0.0  }
   0x2   :  { %v132_v3 = vld [vmem:[%s523_s4 + $0x10] sm:$0xff]  ;;  %77 = vmatpush.msra.mxu0 %v50_v1  ;;  %281 = vmatpush.msra.mxu2 %v50_v1  ;;  %v48_v5 = vld [vmem:[%s522_s2 + $0x20] sm:$0xff]  ;;  %v49_v6 = vld [vmem:[%s522_s2 + $0x28] sm:$0xff]  ;;  %28 = vst.msk [vmem:[%s528_s6] sm:$0xff] %vm27_vm1, %v295_v32  ;;  %v421_v33 = vand.u32 127, %v123_v30 }
   0x3   :  { %106 = vmatpush.msra.mxu1 %v51_v2  ;;  %285 = vmatpush.msra.mxu3 %v51_v2  ;;  %v46_v7 = vld [vmem:[%s522_s2 + $0x10] sm:$0xff]  ;;  %v32_v8 = vld [vmem:[%s524_s0] sm:$0xff]  ;;  %v47_v10 = vld [vmem:[%s522_s2 + $0x18] sm:$0xff]  ;;  %29 = vst.msk [vmem:[%s528_s6 + $0x8] sm:$0xff] %vm27_vm1, %v295_v32 }
   0x4   :  { %141 = vperm.xlu1 %292, %v132_v3   ;;  %135 = vperm.xlu0 %291, %v130_v4   ;;  %v36_v9 = vld [vmem:[%s525_s1] sm:$0xff]  ;;  %v34_v11 = vld [vmem:[%s524_s0 + $0x10] sm:$0xff]  ;;  %v45_v14 = vld [vmem:[%s522_s2 + $0x8] sm:$0xff]  ;;  %30 = vst.msk [vmem:[%s528_s6 + $0x10] sm:$0xff] %vm27_vm1, %v295_v32  ;;  %v446_v38 = vadd.s32 128, %v421_v33 }
   0x5   :  { %78 = vmatpush.msra.mxu0 %v48_v5  ;;  %282 = vmatpush.msra.mxu2 %v48_v5  ;;  %v38_v12 = vld [vmem:[%s525_s1 + $0x10] sm:$0xff]  ;;  %v44_v13 = vld [vmem:[%s522_s2] sm:$0xff]  ;;  %v40_v15 = vmul.f32 %v36_v9, %v32_v8  ;;  %v133_v17 = vld [vmem:[%s523_s4 + $0x18] sm:$0xff]  ;;  %31 = vst.msk [vmem:[%s528_s6 + $0x18] sm:$0xff] %vm27_vm1, %v295_v32 }
   0x6   :  { %107 = vmatpush.msra.mxu1 %v49_v6  ;;  %286 = vmatpush.msra.mxu3 %v49_v6  ;;  %v42_v16 = vmul.f32 %v38_v12, %v34_v11  ;;  %v131_v18 = vld [vmem:[%s523_s4 + $0x8] sm:$0xff]  ;;  %v35_v21 = vld [vmem:[%s524_s0 + $0x18] sm:$0xff]  ;;  %v172_v23 = vld [vmem:[%s526_s5] sm:$0xff] }
   0x7   :  { %79 = vmatpush.msra.mxu0 %v46_v7  ;;  %283 = vmatpush.msra.mxu2 %v46_v7  ;;  %v33_v19 = vld [vmem:[%s524_s0 + $0x8] sm:$0xff]  ;;  %v39_v22 = vld [vmem:[%s525_s1 + $0x18] sm:$0xff]  ;;  %v174_v27 = vld [vmem:[%s526_s5 + $0x10] sm:$0xff] }
   0x8   :  { %108 = vmatpush.msra.mxu1 %v47_v10  ;;  %287 = vmatpush.msra.mxu3 %v47_v10  ;;  %v37_v20 = vld [vmem:[%s525_s1 + $0x8] sm:$0xff]  ;;  %v43_v25 = vmul.f32 %v39_v22, %v35_v21  ;;  %v175_v26 = vld [vmem:[%s526_s5 + $0x18] sm:$0xff]  ;;  %v414_v31 = vld [vmem:[%s527_s3] sm:$0xff] }
   0x9   :  { %80 = vmatpush.msra.mxu0 %v44_v13  ;;  %284 = vmatpush.msra.mxu2 %v44_v13  ;;  %v41_v24 = vmul.f32 %v37_v20, %v33_v19  ;;  %v173_v28 = vld [vmem:[%s526_s5 + $0x8] sm:$0xff]  ;;  %v156_v35 = vunpack.c.0.s8 %v414_v31  ;;  %v160_v42 = vunpack.c.2.s8 %v414_v31  ;;  %v158_v48 = vunpack.c.1.s8 %v414_v31 }
   0xa   :  { %109 = vmatpush.msra.mxu1 %v45_v14  ;;  %288 = vmatpush.msra.mxu3 %v45_v14  ;;  %v426_v34 = vld [vmem:[%s527_s3 + $0x8] sm:$0xff]  ;;  %v162_v63 = vunpack.c.3.s8 %v414_v31 }
   0xb   :  { %265 = vmatmul.msk.f32.vlgmr.msra.gmra.mxu0 %vm52_vm0, %v40_v15  ;;  %267 = vmatmul.msk.f32.vlgmr.msra.gmra.mxu2 %vm52_vm0, %v42_v16  ;;  %v157_v37 = vunpack.c.0.s8 %v426_v34  ;;  %vm164_vm2 = vcmp.gt.s32.totalorder %v156_v35, 0  ;;  %v161_v45 = vunpack.c.2.s8 %v426_v34  ;;  %v159_v49 = vunpack.c.1.s8 %v426_v34  ;;  %v214_v30 = vld [vmem:[%s528_s6 + $0x10] sm:$0xff] }
   0xc   :  { %269 = vmatmul.msk.f32.vlgmr.msra.gmra.mxu1 %vm52_vm0, %v40_v15  ;;  %271 = vmatmul.msk.f32.vlgmr.msra.gmra.mxu3 %vm52_vm0, %v42_v16  ;;  %vm454_vm7 = vcmp.gt.s32.totalorder %v160_v42, 0  ;;  %vm464_vm10 = vcmp.gt.s32.totalorder %v158_v48, 0 }
   0xd   :  { %144 = vperm.xlu1 %292, %v133_v17   ;;  %138 = vperm.xlu0 %291, %v131_v18   ;;  %vm165_vm4 = vcmp.gt.s32.totalorder %v157_v37, 0  ;;  %vm459_vm9 = vcmp.gt.s32.totalorder %v161_v45, 0  ;;  %vm468_vm11 = vcmp.gt.s32.totalorder %v159_v49, 0 }
   0xe   :  { %293 = vset.pattern.permute.xlu2 %v294_v0  ;;  %v163_v0 = vunpack.c.3.s8 %v426_v34 }
   0xf   :  { %186 = vperm.xlu2 %293, %v172_v23  }
  0x13   :  { %266 = vmatmul.msk.f32.gmra.mxu0 %vm52_vm0, %v41_v24  ;;  %268 = vmatmul.msk.f32.gmra.mxu2 %vm52_vm0, %v43_v25 }
  0x14   :  { %270 = vmatmul.msk.f32.gmra.mxu1 %vm52_vm0, %v41_v24  ;;  %272 = vmatmul.msk.f32.gmra.mxu3 %vm52_vm0, %v43_v25 }
  0x15   :  { %201 = vperm.xlu1 %292, %v175_v26   ;;  %196 = vperm.xlu0 %291, %v174_v27   ;;  %v212_v27 = vld [vmem:[%s528_s6] sm:$0xff] }
  0x17   :  { %191 = vperm.xlu2 %293, %v173_v28  }
  0x69   :  { %v187_v40 = vpop.permute.xlu2 %186 }
  0x71   :  { %v192_v5 = vpop.permute.xlu2 %191 }
  0x76   :  { %v136_v29 = vpop.permute.xlu0 %135  ;;  %v142_v36 = vpop.permute.xlu1 %141 }
  0x77   :  { %vm146_vm3 = vcmp.eq.s32.totalorder %v421_v33, %v136_v29  ;;  %vm147_vm5 = vcmp.eq.s32.totalorder %v446_v38, %v136_v29  ;;  %vm150_vm12 = vcmp.eq.s32.totalorder %v421_v33, %v142_v36  ;;  %vm151_vm13 = vcmp.eq.s32.totalorder %v446_v38, %v142_v36  ;;  %v215_v36 = vld [vmem:[%s528_s6 + $0x18] sm:$0xff] }
  0x7f   :  { %v139_v39 = vpop.permute.xlu0 %138  ;;  %v145_v53 = vpop.permute.xlu1 %144 }
  0x80   :  { %vm148_vm14 = vcmp.eq.s32.totalorder %v421_v33, %v139_v39  ;;  %vm149_vm15 = vcmp.eq.s32.totalorder %v446_v38, %v139_v39 }
  0x87   :  { %v197_v60 = vpop.permute.xlu0 %196  ;;  %v202_v18 = vpop.permute.xlu1 %201 }
  0x88   :  { %v82_v41 = vpop.f32.mrf.mxu0 }
  0x89   :  { %v176_v43 = vsel %vm164_vm2, -1000000.0, %v82_v41  ;;  %v111_v44 = vpop.f32.mrf.mxu1 }
  0x8a   :  { %v204_v46 = vsel %vm146_vm3, %v187_v40, %v176_v43  ;;  %v177_v47 = vsel %vm165_vm4, -1000000.0, %v111_v44  ;;  %vm170_vm4 = vcmp.gt.s32.totalorder %v162_v63, 0 }
  0x8b   :  { %v205_v50 = vsel %vm147_vm5, %v187_v40, %v177_v47  ;;  %vm216_vm6 = vcmp.ge.f32.partialorder %v204_v46, %v187_v40 }
  0x8c   :  { %vm217_vm8 = vcmp.ge.f32.partialorder %v205_v50, %v187_v40  ;;  %v273_v52 = vsel %vm216_vm6, 1.0, %v295_v32  ;;  %vm171_vm6 = vcmp.gt.s32.totalorder %v163_v0, 0 }
  0x8d   :  { %v274_v55 = vsel %vm217_vm8, 1.0, %v295_v32  ;;  %vm153_vm8 = vcmp.eq.s32.totalorder %v446_v38, %v145_v53 }
  0x8e   :  { %v88_v56 = vpop.f32.mrf.mxu2  ;;  %v240_v57 = vadd.f32 %v274_v55, %v273_v52 }
  0x8f   :  { %v180_v61 = vsel %vm454_vm7, -1000000.0, %v88_v56  ;;  %v117_v62 = vpop.f32.mrf.mxu3  ;;  %vm152_vm7 = vcmp.eq.s32.totalorder %v421_v33, %v145_v53 }
  0x90   :  { %v208_v1 = vsel %vm150_vm12, %v197_v60, %v180_v61  ;;  %v181_v2 = vsel %vm459_vm9, -1000000.0, %v117_v62  ;;  %241 = vadd.xlane.f32.xlu2 %v240_v57  ;;  %v85_v3 = vpop.f32.mrf.mxu0 }
  0x91   :  { %v209_v4 = vsel %vm151_vm13, %v197_v60, %v181_v2  ;;  %v178_v6 = vsel %vm464_vm10, -1000000.0, %v85_v3  ;;  %v114_v7 = vpop.f32.mrf.mxu1  ;;  %vm220_vm0 = vcmp.ge.f32.partialorder %v208_v1, %v197_v60 }
  0x92   :  { %v206_v8 = vsel %vm148_vm14, %v192_v5, %v178_v6  ;;  %v179_v9 = vsel %vm468_vm11, -1000000.0, %v114_v7  ;;  %vm221_vm2 = vcmp.ge.f32.partialorder %v209_v4, %v197_v60  ;;  %v277_v10 = vsel %vm220_vm0, 1.0, %v295_v32 }
  0x93   :  { %v207_v11 = vsel %vm149_vm15, %v192_v5, %v179_v9  ;;  %v278_v12 = vsel %vm221_vm2, 1.0, %v295_v32  ;;  %vm218_vm3 = vcmp.ge.f32.partialorder %v206_v8, %v192_v5 }
  0x94   :  { %v246_v13 = vadd.f32 %v278_v12, %v277_v10  ;;  %vm219_vm5 = vcmp.ge.f32.partialorder %v207_v11, %v192_v5  ;;  %v275_v14 = vsel %vm218_vm3, 1.0, %v295_v32 }
  0x95   :  { %v276_v15 = vsel %vm219_vm5, 1.0, %v295_v32 }
  0x96   :  { %247 = vadd.xlane.f32.xlu1 %v246_v13  ;;  %v91_v16 = vpop.f32.mrf.mxu2  ;;  %v243_v17 = vadd.f32 %v276_v15, %v275_v14 }
  0x97   :  { %v182_v19 = vsel %vm170_vm4, -1000000.0, %v91_v16  ;;  %v120_v20 = vpop.f32.mrf.mxu3 }
  0x98   :  { %v210_v21 = vsel %vm152_vm7, %v202_v18, %v182_v19  ;;  %v183_v22 = vsel %vm171_vm6, -1000000.0, %v120_v20  ;;  %244 = vadd.xlane.f32.xlu0 %v243_v17 }
  0x99   :  { %v211_v23 = vsel %vm153_vm8, %v202_v18, %v183_v22  ;;  %vm222_vm9 = vcmp.ge.f32.partialorder %v210_v21, %v202_v18 }
  0x9a   :  { %vm223_vm10 = vcmp.ge.f32.partialorder %v211_v23, %v202_v18  ;;  %v279_v24 = vsel %vm222_vm9, 1.0, %v295_v32 }
  0x9b   :  { %v280_v25 = vsel %vm223_vm10, 1.0, %v295_v32  ;;  %v213_v32 = vld [vmem:[%s528_s6 + $0x8] sm:$0xff] }
  0x9c   :  { %v249_v26 = vadd.f32 %v280_v25, %v279_v24 }
  0x9e   :  { %250 = vadd.xlane.f32.xlu2 %v249_v26 }
 0x103   :  { %v242_v28 = vpop.xlane.xlu2 %241 }
 0x104   :  { %v252_v29 = vadd.f32 %v242_v28, %v212_v27 }
 0x106   :  { %257 = vst.msk [vmem:[%s528_s6] sm:$0xff] %vm27_vm1, %v252_v29 }
 0x109   :  { %v248_v31 = vpop.xlane.xlu1 %247 }
 0x10a   :  { %v254_v33 = vadd.f32 %v248_v31, %v214_v30 }
 0x10b   :  { %v245_v34 = vpop.xlane.xlu0 %244 }
 0x10c   :  { %259 = vst.msk [vmem:[%s528_s6 + $0x10] sm:$0xff] %vm27_vm1, %v254_v33  ;;  %v253_v35 = vadd.f32 %v245_v34, %v213_v32 }
 0x10e   :  { %258 = vst.msk [vmem:[%s528_s6 + $0x8] sm:$0xff] %vm27_vm1, %v253_v35 }
 0x111   :  { %v251_v37 = vpop.xlane.xlu2 %250 }
 0x112   :  { %v255_v38 = vadd.f32 %v251_v37, %v215_v36 }
 0x114   :  { %260 = vst.msk [vmem:[%s528_s6 + $0x18] sm:$0xff] %vm27_vm1, %v255_v38 }

</bundles_post_ra>
